<compile_context>
chip_gen: v7x
topology: tpu7x:2x2x1
jax: 0.10.0
libtpu: 0.0.40
codegen_flags: <defaults>
</compile_context>

<pallas_src>
import functools

import numpy as np
import jax
import jax.numpy as jnp
from jax.experimental import pallas as pl
from jax.experimental.pallas import tpu as pltpu


def _round_up(x: int, m: int) -> int:
    return ((x + m - 1) // m) * m


# ----------------------------------------------------------------------------
# Kernel
# ----------------------------------------------------------------------------
def _relpos_kernel(ego_ref, pos_ref, out_x_ref, out_y_ref):
    """One grid step = one lane-tile of agents, ALL egos at once.

    ego_ref   : VMEM (E_pad, 4)      f32  rows = egos; cols = [ex, ey, sin(-yaw), cos(-yaw)]
    pos_ref   : VMEM (2, TILE_N)     f32  row 0 = agent x, row 1 = agent y (this tile)
    out_x_ref : VMEM (E_pad, TILE_N)      local-frame x of every agent, per ego
    out_y_ref : VMEM (E_pad, TILE_N)      local-frame y of every agent, per ego
    """
    ego = ego_ref[...]            # (E, 4)
    ex = ego[:, 0:1]              # (E, 1)   lane-broadcast columns
    ey = ego[:, 1:2]
    s = ego[:, 2:3]               # sin(-yaw)
    c = ego[:, 3:4]               # cos(-yaw)

    px = pos_ref[0:1, :]          # (1, TN)  sublane-broadcast rows
    py = pos_ref[1:2, :]

    # rel = positions - ego_pos, broadcast to (E, TN) -- pure VPU work.
    rx = px - ex
    ry = py - ey

    # out = rel @ R.T with R = [[s, c], [-c, s]]:
    #   out_x =  rx*s + ry*c
    #   out_y = -rx*c + ry*s
    out_x_ref[...] = (rx * s + ry * c).astype(out_x_ref.dtype)
    out_y_ref[...] = (ry * s - rx * c).astype(out_y_ref.dtype)


# ----------------------------------------------------------------------------
# Tiling / launch
# ----------------------------------------------------------------------------
_TARGET_STEP_BYTES = 2 << 20    # ~2 MiB of output writeback per grid step
_VMEM_BUDGET_BYTES = 12 << 20   # double-buffered working set; safe on v5e/v6e/v7x


def _choose_tile_n(e_pad: int, n_pad: int, out_itemsize: int) -> int:
    """Byte-targeted lane-tile width (multiple of 128)."""
    per_lane_out_bytes = 2 * e_pad * out_itemsize  # both output planes, one agent column
    tile_n = max(_TARGET_STEP_BYTES // max(per_lane_out_bytes, 1), 512)
    tile_n = min(_round_up(tile_n, 128), n_pad)

    def vmem_bytes(t):
        out_b = 2 * e_pad * t * out_itemsize   # two output planes
        in_b = 2 * t * 4                       # position tile (f32)
        return 2 * (out_b + in_b)              # double-buffered

    while tile_n > 128 and vmem_bytes(tile_n) > _VMEM_BUDGET_BYTES:
        tile_n = max(_round_up(tile_n // 2, 128), 128)

    # Guarantee >=2 grid steps when possible so dimension_semantics=("parallel",)
    # can shard across v7x's two TensorCores (harmless on v5e/v6e).
    if tile_n >= n_pad and n_pad >= 256:
        tile_n = _round_up(pl.cdiv(n_pad, 2), 128)
    return tile_n


@functools.partial(jax.jit, static_argnames=("tile_n", "out_dtype"))
def _relpos_pallas_planar(ego_params, pos_cm, *, tile_n, out_dtype):
    """ego_params: (E_pad, 4) f32, pos_cm: (2, N_pad) f32 -> (out_x, out_y)."""
    e_pad = ego_params.shape[0]
    n_pad = pos_cm.shape[1]
    grid_n = pl.cdiv(n_pad, tile_n)   # only the final tile pays a masked edge store
    out_itemsize = np.dtype(out_dtype).itemsize

    cost = pl.CostEstimate(
        flops=8 * e_pad * n_pad,
        transcendentals=0,
        bytes_accessed=2 * e_pad * n_pad * out_itemsize + 2 * n_pad * 4 + e_pad * 16,
    )

    return pl.pallas_call(
        _relpos_kernel,
        out_shape=(
            jax.ShapeDtypeStruct((e_pad, n_pad), out_dtype),
            jax.ShapeDtypeStruct((e_pad, n_pad), out_dtype),
        ),
        grid_spec=pltpu.PrefetchScalarGridSpec(
            num_scalar_prefetch=0,
            grid=(grid_n,),
            in_specs=[
                # Tiny constant ego block: constant index_map -> DMA'd once.
                pl.BlockSpec((e_pad, 4), lambda j: (0, 0)),
                # One lane tile of agent positions per step.
                pl.BlockSpec((2, tile_n), lambda j: (0, j)),
            ],
            out_specs=[
                pl.BlockSpec((e_pad, tile_n), lambda j: (0, j)),
                pl.BlockSpec((e_pad, tile_n), lambda j: (0, j)),
            ],
        ),
        compiler_params=pltpu.CompilerParams(
            # Agent tiles are independent -> megacore-shardable on v7x.
            dimension_semantics=("parallel",),
            vmem_limit_bytes=32 * 1024 * 1024,  # <= v7x default scoped limit
        ),
        cost_estimate=cost,
    )(ego_params, pos_cm)


def _relpos_xla_planar(ego_pos, ego_yaw, positions):
    """Fused-XLA fallback for small problems (custom-call launch would dominate)."""
    rel = positions[None, :, :] - ego_pos[:, None, :]        # (E, N, 2)
    s = jnp.sin(-ego_yaw)[:, None]
    c = jnp.cos(-ego_yaw)[:, None]
    out_x = rel[..., 0] * s + rel[..., 1] * c
    out_y = rel[..., 1] * s - rel[..., 0] * c
    return out_x, out_y


# ----------------------------------------------------------------------------
# Public API
# ----------------------------------------------------------------------------
def related_pos_with_direction_planar(ego_pos, ego_yaw, positions, *,
                                      tile_n=None, out_dtype=jnp.float32,
                                      use_pallas=None):
    """Batched VLMPlannerBase._get_related_pos_with_direction, planar layout.

    Args:
      ego_pos:   (N_ego, 2) f32 global ego positions.
      ego_yaw:   (N_ego,)   f32 ego yaw angles (radians).
      positions: (N, 2)     f32 global agent positions.
      tile_n:    optional lane-tile width override (rounded to 128).
      out_dtype: output dtype (f32 default; bf16 halves the dominant writeback,
                 arithmetic stays f32).
      use_pallas: force/forbid the Pallas path; None = output-size heuristic.

    Returns:
      (out_x, out_y): each (N_ego, N). out_x[i, j], out_y[i, j] are agent j's
      coordinates in ego-i's local frame (lane-dense: last axis = agents).
    """
    ego_pos = jnp.asarray(ego_pos, jnp.float32)
    ego_yaw = jnp.asarray(ego_yaw, jnp.float32)
    positions = jnp.asarray(positions, jnp.float32)

    n_ego = ego_pos.shape[0]
    n = positions.shape[0]

    if use_pallas is None:
        # Below ~64K output elements (~0.5 MiB f32) launch overhead dominates;
        # let XLA fuse the elementwise math instead.
        use_pallas = (n_ego * n) >= (1 << 16)
    if not use_pallas:
        out_x, out_y = _relpos_xla_planar(ego_pos, ego_yaw, positions)
        return out_x.astype(out_dtype), out_y.astype(out_dtype)

    out_itemsize = np.dtype(out_dtype).itemsize
    sublane = 8 if out_itemsize >= 4 else 16      # bf16 packs 16 rows / vreg
    e_pad = _round_up(max(n_ego, 1), sublane)
    n_pad = _round_up(max(n, 1), 128)             # lane multiple only; NOT tile multiple
    if tile_n is None:
        tile_n = _choose_tile_n(e_pad, n_pad, out_itemsize)
    else:
        tile_n = min(_round_up(tile_n, 128), n_pad)

    # Pack per-ego parameters: [ex, ey, sin(-yaw), cos(-yaw)] per sublane.
    ego_params = jnp.zeros((e_pad, 4), jnp.float32)
    ego_params = ego_params.at[:n_ego, 0].set(ego_pos[:, 0])
    ego_params = ego_params.at[:n_ego, 1].set(ego_pos[:, 1])
    ego_params = ego_params.at[:n_ego, 2].set(jnp.sin(-ego_yaw))
    ego_params = ego_params.at[:n_ego, 3].set(jnp.cos(-ego_yaw))

    # Coordinate-major, lane-padded agent positions.
    pos_cm = jnp.zeros((2, n_pad), jnp.float32).at[:, :n].set(positions.T)

    out_x, out_y = _relpos_pallas_planar(ego_params, pos_cm,
                                         tile_n=tile_n, out_dtype=out_dtype)
    return out_x[:n_ego, :n], out_y[:n_ego, :n]


def related_pos_with_direction(ego_pos, ego_yaw, positions, **kwargs):
    """Module-convention output: (N_ego, N, 2).

    Compatibility wrapper: the (..., 2) restack re-reads/re-writes the whole
    output; prefer the planar API for downstream TPU consumers.
    """
    out_x, out_y = related_pos_with_direction_planar(ego_pos, ego_yaw, positions, **kwargs)
    return jnp.stack([out_x, out_y], axis=-1)


def vlm_planner_forward(detmap_pose, ego_yaw, **kwargs):
    """Pallas-backed stand-in for the numeric part of forward_single_collab:
    for each ego agent i, every agent's position expressed in ego-i's local
    frame (what feeds the collab-agent description)."""
    positions = detmap_pose[:, :2]
    return related_pos_with_direction(positions, ego_yaw, positions, **kwargs)


def _reference(ego_pos, ego_yaw, positions):
    """Pure-JAX reference mirroring the PyTorch/numpy code, per ego agent."""
    outs = []
    for i in range(ego_pos.shape[0]):
        rel = positions - ego_pos[i]
        s = jnp.sin(-ego_yaw[i])
        c = jnp.cos(-ego_yaw[i])
        R = jnp.array([[s, c], [-c, s]], jnp.float32)
        outs.append(rel @ R.T)
    return jnp.stack(outs)


if __name__ == "__main__":
    key = jax.random.PRNGKey(0)
    k1, k2, k3, k4, k5, k6 = jax.random.split(key, 6)

    # --- Case 1: module-like tiny batch (N_ego = N_agents = 8), force Pallas. ---
    n_agents = 8
    detmap_pose = jax.random.normal(k1, (n_agents, 4), jnp.float32) * 10.0  # (x, y, ...)
    ego_yaw = jax.random.uniform(k2, (n_agents,), jnp.float32, -3.14, 3.14)

    out = vlm_planner_forward(detmap_pose, ego_yaw, use_pallas=True)
    out = jax.block_until_ready(out)
    ref = _reference(detmap_pose[:, :2], ego_yaw, detmap_pose[:, :2])
    assert out.shape == (n_agents, n_agents, 2)
    assert jnp.allclose(out, ref, atol=1e-5, rtol=1e-5)

    # Same tiny case through the auto heuristic (fused-XLA path).
    out_xla = vlm_planner_forward(detmap_pose, ego_yaw)
    out_xla = jax.block_until_ready(out_xla)
    assert jnp.allclose(out_xla, ref, atol=1e-5, rtol=1e-5)

    # --- Case 2: non-multiple shapes (sublane/lane padding, >=2 grid steps,
    #     masked edge tile via cdiv grid). ---
    n_ego2, n_agents2 = 5, 300
    ego_pos2 = jax.random.normal(k3, (n_ego2, 2), jnp.float32) * 25.0
    ego_yaw2 = jax.random.uniform(k4, (n_ego2,), jnp.float32, -3.14, 3.14)
    positions2 = jax.random.normal(k1, (n_agents2, 2), jnp.float32) * 50.0

    ox, oy = related_pos_with_direction_planar(ego_pos2, ego_yaw2, positions2,
                                               use_pallas=True)
    ox = jax.block_until_ready(ox)
    oy = jax.block_until_ready(oy)
    ref2 = _reference(ego_pos2, ego_yaw2, positions2)
    assert ox.shape == (n_ego2, n_agents2) and oy.shape == (n_ego2, n_agents2)
    assert jnp.allclose(ox, ref2[..., 0], atol=1e-4, rtol=1e-4)
    assert jnp.allclose(oy, ref2[..., 1], atol=1e-4, rtol=1e-4)

    # --- Case 3: larger agent count, bf16 output planes (f32 arithmetic). ---
    n_ego3, n_agents3 = 8, 2048
    ego_pos3 = jax.random.normal(k5, (n_ego3, 2), jnp.float32) * 25.0
    ego_yaw3 = jax.random.uniform(k6, (n_ego3,), jnp.float32, -3.14, 3.14)
    positions3 = jax.random.normal(k2, (n_agents3, 2), jnp.float32) * 50.0

    bx, by = related_pos_with_direction_planar(ego_pos3, ego_yaw3, positions3,
                                               use_pallas=True,
                                               out_dtype=jnp.bfloat16)
    bx = jax.block_until_ready(bx)
    by = jax.block_until_ready(by)
    ref3 = _reference(ego_pos3, ego_yaw3, positions3)
    assert bx.shape == (n_ego3, n_agents3) and bx.dtype == jnp.bfloat16
    assert jnp.allclose(bx.astype(jnp.float32), ref3[..., 0], atol=2.0, rtol=2e-2)
    assert jnp.allclose(by.astype(jnp.float32), ref3[..., 1], atol=2.0, rtol=2e-2)

    print("KERNEL_OK")
</pallas_src>

<mosaic_0001>
module attributes {stable_mosaic.version = 11 : i64} {
  func.func @_relpos_kernel(%arg0: i32, %arg1: memref<8x4xf32, #tpu.memory_space<vmem>>, %arg2: memref<2x128xf32, #tpu.memory_space<vmem>>, %arg3: memref<8x128xf32, #tpu.memory_space<vmem>>, %arg4: memref<8x128xf32, #tpu.memory_space<vmem>>) attributes {dimension_semantics = [#tpu.dimension_semantics<parallel>], iteration_bounds = array<i64: 1>, scalar_prefetch = 0 : i64, scratch_operands = 0 : i64, tpu.core_type = #tpu.core_type<tc>, window_params = [{pipeline_mode = #tpu.pipeline_mode<synchronous>, transform_indices = @transform_0, window_bounds = array<i64: 8, 4>}, {transform_indices = @transform_1, window_bounds = array<i64: 2, 128>}, {transform_indices = @transform_2, window_bounds = array<i64: 8, 128>}, {transform_indices = @transform_3, window_bounds = array<i64: 8, 128>}]} {
    %c0 = arith.constant 0 : index
    %c0_0 = arith.constant 0 : index
    %0 = vector.load %arg1[%c0, %c0_0] : memref<8x4xf32, #tpu.memory_space<vmem>>, vector<8x4xf32>
    %1 = vector.extract_strided_slice %0 {offsets = [0, 0], sizes = [8, 1], strides = [1, 1]} : vector<8x4xf32> to vector<8x1xf32>
    %2 = vector.extract_strided_slice %0 {offsets = [0, 1], sizes = [8, 1], strides = [1, 1]} : vector<8x4xf32> to vector<8x1xf32>
    %3 = vector.extract_strided_slice %0 {offsets = [0, 2], sizes = [8, 1], strides = [1, 1]} : vector<8x4xf32> to vector<8x1xf32>
    %4 = vector.extract_strided_slice %0 {offsets = [0, 3], sizes = [8, 1], strides = [1, 1]} : vector<8x4xf32> to vector<8x1xf32>
    %c0_1 = arith.constant 0 : index
    %c0_2 = arith.constant 0 : index
    %5 = vector.load %arg2[%c0_1, %c0_2] : memref<2x128xf32, #tpu.memory_space<vmem>>, vector<1x128xf32>
    %c1 = arith.constant 1 : index
    %c0_3 = arith.constant 0 : index
    %6 = vector.load %arg2[%c1, %c0_3] : memref<2x128xf32, #tpu.memory_space<vmem>>, vector<1x128xf32>
    %7 = vector.broadcast %5 : vector<1x128xf32> to vector<8x128xf32>
    %8 = vector.broadcast %1 : vector<8x1xf32> to vector<8x128xf32>
    %9 = arith.subf %7, %8 : vector<8x128xf32>
    %10 = vector.broadcast %6 : vector<1x128xf32> to vector<8x128xf32>
    %11 = vector.broadcast %2 : vector<8x1xf32> to vector<8x128xf32>
    %12 = arith.subf %10, %11 : vector<8x128xf32>
    %13 = vector.broadcast %3 : vector<8x1xf32> to vector<8x128xf32>
    %14 = arith.mulf %9, %13 : vector<8x128xf32>
    %15 = vector.broadcast %4 : vector<8x1xf32> to vector<8x128xf32>
    %16 = arith.mulf %12, %15 : vector<8x128xf32>
    %17 = arith.addf %14, %16 : vector<8x128xf32>
    %c0_4 = arith.constant 0 : index
    %c0_5 = arith.constant 0 : index
    %18 = vector.load %arg3[%c0_4, %c0_5] : memref<8x128xf32, #tpu.memory_space<vmem>>, vector<8x128xf32>
    tpu.vector_store %arg3[%c0_4, %c0_5], %17 {strides = array<i32>} : memref<8x128xf32, #tpu.memory_space<vmem>>, vector<8x128xf32>,
    %19 = vector.broadcast %3 : vector<8x1xf32> to vector<8x128xf32>
    %20 = arith.mulf %12, %19 : vector<8x128xf32>
    %21 = vector.broadcast %4 : vector<8x1xf32> to vector<8x128xf32>
    %22 = arith.mulf %9, %21 : vector<8x128xf32>
    %23 = arith.subf %20, %22 : vector<8x128xf32>
    %c0_6 = arith.constant 0 : index
    %c0_7 = arith.constant 0 : index
    %24 = vector.load %arg4[%c0_6, %c0_7] : memref<8x128xf32, #tpu.memory_space<vmem>>, vector<8x128xf32>
    tpu.vector_store %arg4[%c0_6, %c0_7], %23 {strides = array<i32>} : memref<8x128xf32, #tpu.memory_space<vmem>>, vector<8x128xf32>,
    return
  }
  func.func @transform_0(%arg0: i32) -> (i32, i32) {
    %c0_i32 = arith.constant 0 : i32
    %c0_i32_0 = arith.constant 0 : i32
    %c0_i32_1 = arith.constant 0 : i32
    return %c0_i32, %c0_i32_0 : i32, i32
  }
  func.func @transform_1(%arg0: i32) -> (i32, i32) {
    %c0_i32 = arith.constant 0 : i32
    %c0_i32_0 = arith.constant 0 : i32
    return %c0_i32, %arg0 : i32, i32
  }
  func.func @transform_2(%arg0: i32) -> (i32, i32) {
    %c0_i32 = arith.constant 0 : i32
    %c0_i32_0 = arith.constant 0 : i32
    return %c0_i32, %arg0 : i32, i32
  }
  func.func @transform_3(%arg0: i32) -> (i32, i32) {
    %c0_i32 = arith.constant 0 : i32
    %c0_i32_0 = arith.constant 0 : i32
    return %c0_i32, %arg0 : i32, i32
  }
}

</mosaic_0001>

<bundles_post_ra>
// kernel: _relpos_pallas_planar.1
= control target key start
LH: loop header
LB: loop body
LE: loop exit
PB: predicated region body
PF: predicated region fallthrough
CT: control target
= control target key end

     0   :  { %9 = vsyncpa [#allocation3], 0  ;;  %v142_v1 = vmov 2   ;;  %v143_v2 = vmov 0   ;;  %s201_s0 = inlined_call_operand.vmem [shape: f32[8,4], index: 0, kind: input, shape index: {}]   ;;  %s202_s1 = inlined_call_operand.vmem [shape: f32[2,128], index: 1, kind: input, shape index: {}]   ;;  %s203_s2 = inlined_call_operand.hbm [shape: f32[8,128], index: 2, kind: output, shape index: {0}]   ;;  %s204_s3 = inlined_call_operand.hbm [shape: f32[8,128], index: 3, kind: output, shape index: {1}]  }
   0x1   :  { %v15_v0 = vld [vmem:[%s201_s0] sm:$0xff]  ;;  %91 = vset.pattern.permute.xlu1 %v142_v1  ;;  %89 = vset.pattern.permute.xlu0 %v143_v2 }
   0x2   :  { %10 = vsyncpa [#allocation5], 0  ;;  %38 = vperm.xlu1 %91, %v15_v0   ;;  %24 = vperm.xlu0 %89, %v15_v0   ;;  %v144_v3 = vmov 3   ;;  %v145_v4 = vmov 1   ;;  %v81_v7 = vld [vmem:[%s202_s1] ss:$0 sm:$0xff] }
   0x3   :  { %v82_v8 = vld [vmem:[%s202_s1 + $0x1] ss:$0 sm:$0xff]  ;;  %s146_s17 = smov [#allocation2]   ;;  %s147_s19 = smov [#allocation4]  }
   0x4   :  { %s59_s18 = sshll.u32 %s146_s17, 4  ;;  %s69_s20 = sshll.u32 %s147_s19, 4  ;;  %s60_s18 = int_to_ptr.vmem [resolvable:$true] %s59_s18  ;;  %s70_s20 = int_to_ptr.vmem [resolvable:$true] %s69_s20 }
   0x5   :  { %s94_s21 = scalar_lea.vmem %s60_s18, 128  ;;  %p99_p1 = scmp.lt.s32.totalorder %s60_s18, %s60_s18 }
   0x6   :  { %92 = vset.pattern.permute.xlu1 %v144_v3  ;;  %90 = vset.pattern.permute.xlu0 %v145_v4  ;;  %p95_p0 = scmp.ne.s32.totalorder %s60_s18, %s94_s21  ;;  %p100_p2 = scmp.lt.s32.totalorder %s94_s21, %s94_s21 }
   0x7   :  { %43 = vperm.xlu1 %92, %v15_v0   ;;  %33 = vperm.xlu0 %90, %v15_v0  }
   0x8   :  { %p101_p3 = por %p100_p2, %p99_p1 }
   0xa   :  { %p102_p4 = pnand %p101_p3, %p95_p0 }
   0xb   :  { %93 = vset.pattern.permute.xlu0 %v144_v3 }
  0x81   :  { %v25_v5 = vpop.permute.xlu0 %24  ;;  %v39_v6 = vpop.permute.xlu1 %38 }
  0x82   :  { %v27_v9 = vsub.f32 %v81_v7, %v25_v5 }
  0x84   :  { %v41_v13 = vmul.f32 %v39_v6, %v27_v9 }
  0x86   :  { %v44_v10 = vpop.permute.xlu1 %43  ;;  %v34_v11 = vpop.permute.xlu0 %33 }
  0x87   :  { %v36_v12 = vsub.f32 %v82_v8, %v34_v11  ;;  %v50_v14 = vmul.f32 %v44_v10, %v27_v9 }
  0x89   :  { %v46_v15 = vmul.f32 %v44_v10, %v36_v12  ;;  %v49_v16 = vmul.f32 %v39_v6, %v36_v12 }
  0x8b   :  { %v47_v17 = vadd.f32 %v46_v15, %v41_v13  ;;  %v51_v18 = vsub.f32 %v49_v16, %v50_v14 }
  0x8d   :  { %48 = vst [vmem:[#allocation2] sm:$0xff] %v47_v17  ;;  %52 = vst [vmem:[#allocation4] sm:$0xff] %v51_v18 }
  0x8e   :  { %105 = shalt.err (!%p102_p4)
}
  0x8f   :  { %s106_s23 = scalar_lea.hbm %s203_s2, 128 }
  0x90   :  { %p107_p5 = scmp.ne.s32.totalorder %s203_s2, %s106_s23  ;;  %p110_p6 = scmp.lt.u32.totalorder %s106_s23, %s203_s2 }
  0x92   :  { %p112_p7 = pnand %p110_p6, %p107_p5 }
  0x94   :  { %115 = shalt.err (!%p112_p7)
}
  0x95   :  { %62 = dma.vmem_to_hbm [thread:$0]  %s60_s18, 128, %s203_s2, [#allocation3]  }
  0x96   :  { %s116_s30 = scalar_lea.vmem %s70_s20, 128  ;;  %p121_p9 = scmp.lt.s32.totalorder %s70_s20, %s70_s20 }
  0x97   :  { %p117_p8 = scmp.ne.s32.totalorder %s70_s20, %s116_s30  ;;  %p122_p10 = scmp.lt.s32.totalorder %s116_s30, %s116_s30 }
  0x99   :  { %p123_p11 = por %p122_p10, %p121_p9 }
  0x9b   :  { %p124_p12 = pnand %p123_p11, %p117_p8 }
  0x9d   :  { %127 = shalt.err (!%p124_p12)
}
  0x9e   :  { %s128_s6 = scalar_lea.hbm %s204_s3, 128 }
  0x9f   :  { %p129_p13 = scmp.ne.s32.totalorder %s204_s3, %s128_s6  ;;  %p132_p0 = scmp.lt.u32.totalorder %s128_s6, %s204_s3 }
  0xa1   :  { %p134_p1 = pnand %p132_p0, %p129_p13 }
  0xa3   :  { %137 = shalt.err (!%p134_p1)
}
  0xa4   :  { %72 = dma.vmem_to_hbm [thread:$0]  %s70_s20, 128, %s204_s3, [#allocation5]  }
  0xa5   :  { %138 = dma.done.wait [#allocation3], 128  }
  0xa6   :  { %139 = vsyncadd [#allocation3], 4294967168 }
  0xa7   :  { %140 = dma.done.wait [#allocation5], 128  }
  0xa8   :  { %141 = vsyncadd [#allocation5], 4294967168 }
  0xa9   :  { %79 = vsyncpa [#allocation3], 1 }
  0xaa   :  { %80 = vsyncpa [#allocation5], 1 }

</bundles_post_ra>
